<compile_context>
chip_gen: v7x
topology: tpu7x:2x2x1
jax: 0.10.0
libtpu: 0.0.40
codegen_flags: <defaults>
</compile_context>

<pallas_src>
import jax
import jax.numpy as jnp
from jax.experimental import pallas as pl
from jax.experimental.pallas import tpu as pltpu

LANE = 128                 # vreg lane width
SUBL = 8                   # vreg sublane count
TARGET_BLOCK_ROWS = 512    # rows per grid step (512x128 f32 = 256 KiB/buffer)


def _cdiv(a, b):
    return -(-a // b)


def _round_up(a, b):
    return _cdiv(a, b) * b


def _disc_loss_kernel(pr_ref, pf_ref, out_ref):
    """Grid = (num_parallel, blocks_per_core).

    pr_ref / pf_ref : (block_rows, 128) tiles of the flattened inputs.
    out_ref         : (2, 8, 128) f32 accumulator block, resident across the
                      inner ("arbitrary") axis; slot 0 accumulates
                      sum(max(log(pred_real), -100)), slot 1 accumulates
                      sum(max(log(1 - pred_fake), -100)).
    """
    i = pl.program_id(1)

    @pl.when(i == 0)
    def _():
        out_ref[...] = jnp.zeros_like(out_ref)

    pr = pr_ref[...].astype(jnp.float32)
    pf = pf_ref[...].astype(jnp.float32)

    # PyTorch nn.BCELoss clamps the log terms at -100.
    log_pr = jnp.maximum(jnp.log(pr), -100.0)           # target == 1 branch
    log_1mpf = jnp.maximum(jnp.log(1.0 - pf), -100.0)   # target == 0 branch

    # Fold (block_rows, 128) -> (8, 128) with a leading-axis sum: this is a
    # layout-preserving reshape plus pure VPU vreg adds (no XLU, no SMEM).
    nch = log_pr.shape[0] // SUBL
    out_ref[0] += jnp.sum(log_pr.reshape(nch, SUBL, LANE), axis=0)
    out_ref[1] += jnp.sum(log_1mpf.reshape(nch, SUBL, LANE), axis=0)


def _flatten_pad(x, pad_value, total_elems):
    """Flatten in the original dtype; pad only the ragged tail (if any)."""
    flat = x.reshape(-1)
    n = flat.shape[0]
    if n < total_elems:
        flat = jnp.pad(flat, (0, total_elems - n), constant_values=pad_value)
    return flat.reshape(total_elems // LANE, LANE)


def discriminator_loss(pred_real, pred_fake):
    """Pallas implementation of DiscriminatorLoss.forward. Returns a scalar."""
    n_real = int(pred_real.size)
    n_fake = int(pred_fake.size)

    rows_min = _cdiv(max(n_real, n_fake), LANE)

    # Split the row range over a leading "parallel" axis (2-TC chips get a
    # ~2x reduction split; 1-TC chips just run it as a 2-step outer loop).
    num_parallel = 2 if rows_min >= 2 * SUBL else 1
    block_rows = min(TARGET_BLOCK_ROWS,
                     _round_up(_cdiv(rows_min, num_parallel), SUBL))
    rows = _round_up(rows_min, block_rows * num_parallel)
    blocks_per_core = rows // (block_rows * num_parallel)
    total_elems = rows * LANE

    # pad value 1.0 -> max(log(1), -100) == 0, neutral for the "real" sum
    pr2d = _flatten_pad(pred_real, 1.0, total_elems)
    # pad value 0.0 -> max(log(1 - 0), -100) == 0, neutral for the "fake" sum
    pf2d = _flatten_pad(pred_fake, 0.0, total_elems)

    in_map = lambda c, i: (c * blocks_per_core + i, 0)

    out = pl.pallas_call(
        _disc_loss_kernel,
        out_shape=jax.ShapeDtypeStruct((num_parallel * 2, SUBL, LANE),
                                       jnp.float32),
        grid_spec=pltpu.PrefetchScalarGridSpec(
            num_scalar_prefetch=0,
            grid=(num_parallel, blocks_per_core),
            in_specs=[
                pl.BlockSpec((block_rows, LANE), in_map),
                pl.BlockSpec((block_rows, LANE), in_map),
            ],
            out_specs=pl.BlockSpec((2, SUBL, LANE), lambda c, i: (c, 0, 0)),
        ),
        compiler_params=pltpu.CompilerParams(
            dimension_semantics=("parallel", "arbitrary")),
    )(pr2d, pf2d)

    # Tiny final reduction + negate + divide in plain JAX (few KiB of data).
    partial = out.reshape(num_parallel, 2, SUBL * LANE).sum(axis=(0, 2))
    return 0.5 * (-partial[0] / n_real + -partial[1] / n_fake)


def _reference_loss(pred_real, pred_fake):
    pr = pred_real.astype(jnp.float32)
    pf = pred_fake.astype(jnp.float32)
    err_real = jnp.mean(-jnp.maximum(jnp.log(pr), -100.0))
    err_fake = jnp.mean(-jnp.maximum(jnp.log(1.0 - pf), -100.0))
    return 0.5 * (err_real + err_fake)


if __name__ == "__main__":
    key = jax.random.PRNGKey(0)
    k1, k2, k3, k4 = jax.random.split(key, 4)

    # Case 1: f32 sigmoid probabilities, NCHW, size divides the tile grid.
    shape = (2, 4, 16, 16)
    pred_real = jax.nn.sigmoid(jax.random.normal(k1, shape, jnp.float32))
    pred_fake = jax.nn.sigmoid(jax.random.normal(k2, shape, jnp.float32))

    loss = discriminator_loss(pred_real, pred_fake)
    jax.block_until_ready(loss)
    ref = _reference_loss(pred_real, pred_fake)
    assert jnp.allclose(loss, ref, rtol=1e-5, atol=1e-5), (loss, ref)

    # Case 2: bf16 inputs with a ragged size (exercises tail padding and the
    # no-upcast DMA path).
    shape2 = (2, 1, 30, 30)
    pr_bf = jax.nn.sigmoid(jax.random.normal(k3, shape2, jnp.float32)).astype(
        jnp.bfloat16)
    pf_bf = jax.nn.sigmoid(jax.random.normal(k4, shape2, jnp.float32)).astype(
        jnp.bfloat16)

    loss2 = discriminator_loss(pr_bf, pf_bf)
    jax.block_until_ready(loss2)
    ref2 = _reference_loss(pr_bf, pf_bf)
    assert jnp.allclose(loss2, ref2, rtol=1e-5, atol=1e-5), (loss2, ref2)

    print("KERNEL_OK")
</pallas_src>

<mosaic_0001>
module attributes {stable_mosaic.version = 11 : i64} {
  func.func @_disc_loss_kernel(%arg0: i32, %arg1: i32, %arg2: memref<8x128xf32, #tpu.memory_space<vmem>>, %arg3: memref<8x128xf32, #tpu.memory_space<vmem>>, %arg4: memref<2x8x128xf32, #tpu.memory_space<vmem>>) attributes {dimension_semantics = [#tpu.dimension_semantics<parallel>, #tpu.dimension_semantics<arbitrary>], iteration_bounds = array<i64: 2, 1>, scalar_prefetch = 0 : i64, scratch_operands = 0 : i64, tpu.core_type = #tpu.core_type<tc>, window_params = [{transform_indices = @transform_0, window_bounds = array<i64: 8, 128>}, {transform_indices = @transform_1, window_bounds = array<i64: 8, 128>}, {transform_indices = @transform_2, window_bounds = array<i64: 2, 8, 128>}]} {
    %c0_i32 = arith.constant 0 : i32
    %0 = arith.cmpi eq, %arg1, %c0_i32 : i32
    %1 = arith.extui %0 : i1 to i32
    %c0_i32_0 = arith.constant 0 : i32
    %2 = arith.cmpi ne, %1, %c0_i32_0 : i32
    scf.if %2 {
      %cst_19 = arith.constant 0.000000e+00 : f32
      %29 = vector.broadcast %cst_19 : f32 to vector<2x8x128xf32>
      %c0_20 = arith.constant 0 : index
      %c0_21 = arith.constant 0 : index
      %c0_22 = arith.constant 0 : index
      %30 = vector.load %arg4[%c0_20, %c0_21, %c0_22] : memref<2x8x128xf32, #tpu.memory_space<vmem>>, vector<2x8x128xf32>
      tpu.vector_store %arg4[%c0_20, %c0_21, %c0_22], %29 {strides = array<i32>} : memref<2x8x128xf32, #tpu.memory_space<vmem>>, vector<2x8x128xf32>,
    } else {
    }
    %c0 = arith.constant 0 : index
    %c0_1 = arith.constant 0 : index
    %3 = vector.load %arg2[%c0, %c0_1] : memref<8x128xf32, #tpu.memory_space<vmem>>, vector<8x128xf32>
    %c0_2 = arith.constant 0 : index
    %c0_3 = arith.constant 0 : index
    %4 = vector.load %arg3[%c0_2, %c0_3] : memref<8x128xf32, #tpu.memory_space<vmem>>, vector<8x128xf32>
    %5 = math.log %3 : vector<8x128xf32>
    %cst = arith.constant -1.000000e+02 : f32
    %6 = vector.broadcast %cst : f32 to vector<8x128xf32>
    %7 = arith.maximumf %5, %6 : vector<8x128xf32>
    %cst_4 = arith.constant 1.000000e+00 : f32
    %8 = vector.broadcast %cst_4 : f32 to vector<8x128xf32>
    %9 = arith.subf %8, %4 : vector<8x128xf32>
    %10 = math.log %9 : vector<8x128xf32>
    %cst_5 = arith.constant -1.000000e+02 : f32
    %11 = vector.broadcast %cst_5 : f32 to vector<8x128xf32>
    %12 = arith.maximumf %10, %11 : vector<8x128xf32>
    %c0_6 = arith.constant 0 : index
    %c0_7 = arith.constant 0 : index
    %c0_8 = arith.constant 0 : index
    %13 = vector.load %arg4[%c0_6, %c0_7, %c0_8] : memref<2x8x128xf32, #tpu.memory_space<vmem>>, vector<1x8x128xf32>
    %14 = vector.shape_cast %13 : vector<1x8x128xf32> to vector<8x128xf32>
    %15 = vector.shape_cast %7 : vector<8x128xf32> to vector<1x8x128xf32>
    %cst_9 = arith.constant dense<0.000000e+00> : vector<8x128xf32>
    %16 = vector.multi_reduction <add>, %15, %cst_9 [0] : vector<1x8x128xf32> to vector<8x128xf32>
    %17 = arith.addf %14, %16 : vector<8x128xf32>
    %c0_10 = arith.constant 0 : index
    %c0_11 = arith.constant 0 : index
    %c0_12 = arith.constant 0 : index
    %18 = vector.load %arg4[%c0_10, %c0_11, %c0_12] : memref<2x8x128xf32, #tpu.memory_space<vmem>>, vector<1x8x128xf32>
    %19 = vector.shape_cast %18 : vector<1x8x128xf32> to vector<8x128xf32>
    %20 = vector.shape_cast %17 : vector<8x128xf32> to vector<1x8x128xf32>
    tpu.vector_store %arg4[%c0_10, %c0_11, %c0_12], %20 {strides = array<i32>} : memref<2x8x128xf32, #tpu.memory_space<vmem>>, vector<1x8x128xf32>,
    %c1 = arith.constant 1 : index
    %c0_13 = arith.constant 0 : index
    %c0_14 = arith.constant 0 : index
    %21 = vector.load %arg4[%c1, %c0_13, %c0_14] : memref<2x8x128xf32, #tpu.memory_space<vmem>>, vector<1x8x128xf32>
    %22 = vector.shape_cast %21 : vector<1x8x128xf32> to vector<8x128xf32>
    %23 = vector.shape_cast %12 : vector<8x128xf32> to vector<1x8x128xf32>
    %cst_15 = arith.constant dense<0.000000e+00> : vector<8x128xf32>
    %24 = vector.multi_reduction <add>, %23, %cst_15 [0] : vector<1x8x128xf32> to vector<8x128xf32>
    %25 = arith.addf %22, %24 : vector<8x128xf32>
    %c1_16 = arith.constant 1 : index
    %c0_17 = arith.constant 0 : index
    %c0_18 = arith.constant 0 : index
    %26 = vector.load %arg4[%c1_16, %c0_17, %c0_18] : memref<2x8x128xf32, #tpu.memory_space<vmem>>, vector<1x8x128xf32>
    %27 = vector.shape_cast %26 : vector<1x8x128xf32> to vector<8x128xf32>
    %28 = vector.shape_cast %25 : vector<8x128xf32> to vector<1x8x128xf32>
    tpu.vector_store %arg4[%c1_16, %c0_17, %c0_18], %28 {strides = array<i32>} : memref<2x8x128xf32, #tpu.memory_space<vmem>>, vector<1x8x128xf32>,
    return
  }
  func.func @transform_0(%arg0: i32, %arg1: i32) -> (i32, i32) {
    %c1_i32 = arith.constant 1 : i32
    %0 = arith.muli %arg0, %c1_i32 : i32
    %1 = arith.addi %0, %arg1 : i32
    %c0_i32 = arith.constant 0 : i32
    %c0_i32_0 = arith.constant 0 : i32
    return %1, %c0_i32 : i32, i32
  }
  func.func @transform_1(%arg0: i32, %arg1: i32) -> (i32, i32) {
    %c1_i32 = arith.constant 1 : i32
    %0 = arith.muli %arg0, %c1_i32 : i32
    %1 = arith.addi %0, %arg1 : i32
    %c0_i32 = arith.constant 0 : i32
    %c0_i32_0 = arith.constant 0 : i32
    return %1, %c0_i32 : i32, i32
  }
  func.func @transform_2(%arg0: i32, %arg1: i32) -> (i32, i32, i32) {
    %c0_i32 = arith.constant 0 : i32
    %c0_i32_0 = arith.constant 0 : i32
    %c0_i32_1 = arith.constant 0 : i32
    return %arg0, %c0_i32, %c0_i32_0 : i32, i32, i32
  }
}

</mosaic_0001>

<bundles_post_ra>
// kernel: tpu_custom_call.1
= control target key start
LH: loop header
LB: loop body
LE: loop exit
PB: predicated region body
PF: predicated region fallthrough
CT: control target
= control target key end

     0   :  { %7 = vsyncpa [#allocation3], 0  ;;  %s846_s0 = inlined_call_operand.hbm [shape: f32[16,128], index: 0, kind: input, shape index: {}]   ;;  %s847_s1 = inlined_call_operand.hbm [shape: f32[16,128], index: 1, kind: input, shape index: {}]   ;;  %s848_s2 = inlined_call_operand.hbm [shape: f32[4,8,128], index: 2, kind: output, shape index: {}]  }
   0x1   :  { %9 = vsyncpa [#allocation3 + $0x1], 0 }
   0x2   :  { %10 = vsyncpa [#allocation6], 0 }
   0x3   :  { %12 = vsyncpa [#allocation6 + $0x1], 0 }
   0x4   :  { %13 = vsyncpa [#allocation4], 0 }
   0x5   :  { %15 = vsyncpa [#allocation4 + $0x1], 0  ;;  %s623_s9 = smov 0   ;;  %s625_s10 = smov 0  }
   0x6   :  { %s627_s11 = smov 0   ;;  %s629_s12 = smov 0  }
   0x7   :  { %s631_s13 = smov 0   ;;  %s633_s14 = smov 0  }
   0x8 LB: > { %s361_s15 = sadd.s32 4294967295, %s601_s14   ;;  %s362_s16 = sadd.s32 4294967294, %s601_s14   ;;  %s601_s14 = sphi %s633_s14, %s21_s14   ;;  %s597_s13 = sphi %s631_s13, %s868_s13   ;;  %s593_s12 = sphi %s629_s12, %s867_s12   ;;  %s589_s11 = sphi %s627_s11, %s866_s11   ;;  %s585_s10 = sphi %s625_s10, %s865_s10   ;;  %s581_s9 = sphi %s623_s9, %s864_s9  }
   0x9   : > { %s33_s17 = sadd.s32 1, %s597_s13  ;;  %s42_s18 = sadd.s32 1, %s589_s11 }
   0xa   : > { %p35_p0 = scmp.ge.s32.totalorder %s33_s17, 2  ;;  %p49_p1 = scmp.ne.s32.totalorder %s589_s11, %s585_s10 }
   0xb   : > { %p50_p2 = scmp.eq.s32.totalorder %s601_s14, 0  ;;  %p55_p3 = scmp.ne.s32.totalorder %s585_s10, %s581_s9 }
   0xc   : > { %s870_s17 = smov (%p35_p0, %s33_s17), 0  ;;  %p56_p5 = scmp.eq.s32.totalorder %s361_s15, 0 }
   0xd   : > { %p664_p4 = por %p50_p2, %p49_p1  ;;  %s39_s20 = ssub.s32 %s597_s13, %s870_s17 }
   0xe   : > { %p107_p6 = scmp.eq.s32.totalorder %s361_s15, 1  ;;  %p40_p7 = scmp.eq.s32.totalorder %s39_s20, 0 }
   0xf   : > { %p670_p8 = por %p56_p5, %p55_p3  ;;  %p113_p10 = scmp.eq.s32.totalorder %s362_s16, 1 }
  0x10   : > { %p674_p9 = por %p107_p6, %p49_p1  ;;  %p398_p13 = scmp.lt.s32.totalorder %s601_s14, 2 }
  0x11   : > { %s852_s21 = scalar_select %p670_p8, 1, 0 }
  0x12   : > { %s853_s22 = scalar_select %p674_p9, 1, 0 }
  0x13   : > { %s679_s23 = scalar_select %p40_p7, %s589_s11, %s42_s18  }
  0x14   : > { %p681_p11 = por %p113_p10, %p55_p3  ;;  %s688_s25 = sand.u32 1, %s589_s11  }
  0x15   : > { %s365_s26 = sshll.u32 %s688_s25, 3  ;;  %s366_s27 = sshll.u32 %s597_s13, 7 }
  0x16   : > { %s854_s24 = scalar_select %p681_p11, 1, 0 }
  0x17   : > { %s697_s30 = scalar_lea.hbm %s846_s0, %s366_s27  ;;  %s137_s3 = scalar_lea.vmem [#allocation2], %s365_s26 }
  0x18   : > { %s145_s4 = sshll.u32 %s137_s3, 4  ;;  %p705_p0 = pnand %p398_p13, %p664_p4  ;;  %s701_s4 = int_to_ptr.vmem [resolvable:$true] %s145_s4 }
  0x19   : > { %s134_s6 = scalar_lea.sflag [#allocation3], %s688_s25  ;;  %s455_s7 = scalar_lea.hbm %s697_s30, 128 }
  0x1a   : > { %p456_p3 = scmp.ne.s32.totalorder %s697_s30, %s455_s7  ;;  %p457_p5 = pneg %p705_p0 }
  0x1b   : > { %s460_s16 = scalar_lea.hbm %s846_s0, 256  ;;  %p461_p4 = scmp.lt.u32.totalorder %s697_s30, %s846_s0 }
  0x1c   : > { %p458_p6 = pnand %p457_p5, %p456_p3  ;;  %p462_p10 = scmp.lt.u32.totalorder %s460_s16, %s455_s7 }
  0x1d   : > { %p464_p12 = scmp.lt.u32.totalorder %s455_s7, %s697_s30 }
  0x1e   : > { %p459_p7 = pneg %p458_p6  ;;  %p463_p13 = por %p462_p10, %p461_p4 }
  0x20   : > { %p465_p1 = por %p464_p12, %p463_p13 }
  0x22   : > { %p466_p2 = pnand %p465_p1, %p459_p7 }
  0x24   : > { %469 = shalt.err (!%p466_p2)
}
  0x25   : > { %s470_s20 = scalar_lea.vmem %s701_s4, 128  ;;  %s603_s28 = smov [#allocation2]  }
  0x26   : > { %p471_p3 = scmp.ne.s32.totalorder %s701_s4, %s470_s20  ;;  %s475_s29 = sshll.u32 %s603_s28, 4  ;;  %s476_s29 = int_to_ptr.vmem [resolvable:$false] %s475_s29 }
  0x27   : > { %s477_s3 = scalar_lea.vmem %s476_s29, 256  ;;  %p478_p9 = scmp.lt.s32.totalorder %s701_s4, %s476_s29 }
  0x28   : > { %p473_p6 = pnand %p471_p3, %p457_p5  ;;  %p479_p4 = scmp.lt.s32.totalorder %s477_s3, %s470_s20 }
  0x2a   : > { %p474_p11 = pneg %p473_p6  ;;  %p480_p10 = por %p479_p4, %p478_p9 }
  0x2c   : > { %p481_p12 = pnand %p480_p10, %p474_p11 }
  0x2e   : > { %484 = shalt.err (!%p481_p12)
}
  0x2f   : > { %390 = dma.hbm_to_vmem [thread:$0]  (!%p705_p0), %s697_s30, 128, %s701_s4, %s134_s6  }
  0x30   : > { %p856_p1 = scmp.lt.s32.totalorder %s601_s14, 3  ;;  %p857_p2 = scmp.ge.s32.totalorder %s601_s14, 1 }
  0x31   : > { %s750_s16 = scalar_lea.hbm %s847_s1, %s366_s27  ;;  %s156_s18 = scalar_lea.vmem [#allocation5], %s365_s26 }
  0x32   : > { %p741_p7 = pnand %p857_p2, %p856_p1  ;;  %s164_s19 = sshll.u32 %s156_s18, 4  ;;  %s165_s19 = int_to_ptr.vmem [resolvable:$true] %s164_s19 }
  0x33   : > { %s153_s30 = scalar_lea.sflag [#allocation6], %s688_s25  ;;  %s485_s4 = scalar_lea.hbm %s750_s16, 128 }
  0x34   : > { %s858_s7 = scalar_select %p741_p7, 1, 0 }
  0x35   : > { %p486_p9 = scmp.ne.s32.totalorder %s750_s16, %s485_s4  ;;  %s490_s27 = scalar_lea.hbm %s847_s1, 256 }
  0x36   : > { %p491_p3 = scmp.lt.u32.totalorder %s750_s16, %s847_s1  ;;  %p492_p6 = scmp.lt.u32.totalorder %s490_s27, %s485_s4 }
  0x37   : > { %p488_p11 = pnand %p486_p9, %p457_p5  ;;  %p494_p10 = scmp.lt.u32.totalorder %s485_s4, %s750_s16 }
  0x38   : > { %p493_p4 = por %p492_p6, %p491_p3 }
  0x39   : > { %p489_p13 = pneg %p488_p11 }
  0x3a   : > { %p495_p12 = por %p494_p10, %p493_p4 }
  0x3c   : > { %p496_p1 = pnand %p495_p12, %p489_p13 }
  0x3e   : > { %499 = shalt.err (!%p496_p1)
}
  0x3f   : > { %s500_s25 = scalar_lea.vmem %s165_s19, 128  ;;  %s604_s26 = smov [#allocation5]  }
  0x40   : > { %p501_p2 = scmp.ne.s32.totalorder %s165_s19, %s500_s25  ;;  %s505_s3 = sshll.u32 %s604_s26, 4  ;;  %s506_s3 = int_to_ptr.vmem [resolvable:$false] %s505_s3 }
  0x41   : > { %s507_s8 = scalar_lea.vmem %s506_s3, 256  ;;  %p508_p8 = scmp.lt.s32.totalorder %s165_s19, %s506_s3 }
  0x42   : > { %p503_p9 = pnand %p501_p2, %p457_p5  ;;  %p509_p7 = scmp.lt.s32.totalorder %s507_s8, %s500_s25 }
  0x44   : > { %p504_p11 = pneg %p503_p9  ;;  %p510_p3 = por %p509_p7, %p508_p8 }
  0x46   : > { %p511_p6 = pnand %p510_p3, %p504_p11 }
  0x48   : > { %514 = shalt.err (!%p511_p6)
}
  0x49   : > { %393 = dma.hbm_to_vmem [thread:$0]  (!%p705_p0), %s750_s16, 128, %s165_s19, %s153_s30  }
  0x4a   : > { %p859_p13 = scmp.ne.s32.totalorder %s858_s7, 0 }
  0x4b   : > { %s777_s15 = sand.u32 (!%p859_p13), 1, %s585_s10   ;;  %p860_p5 = scmp.ne.s32.totalorder (!%p859_p13), %s852_s21, 0 }
  0x4c   : > { %173 = sbr.rel (%p859_p13) target bundleno = 119 (0x77), region = 28  ;;  %s370_s18 = sshll.u32 (!%p859_p13), %s777_s15, 3 }
  0x4d   : > { %s176_s4 = scalar_lea.sflag (!%p859_p13), [#allocation3], %s777_s15  ;;  %s179_s6 = scalar_lea.vmem (!%p859_p13), [#allocation2], %s370_s18 }
  0x53   : > { %568 = dma.done.wait (%p860_p5), %s176_s4, 128  }
  0x54   : > { %570 = vsyncadd (%p860_p5), %s176_s4, 4294967168  ;;  %s185_s5 = scalar_lea.sflag [#allocation6], %s777_s15  ;;  %s188_s16 = scalar_lea.vmem [#allocation5], %s370_s18 }
  0x55   : > { %572 = dma.done.wait (%p860_p5), %s185_s5, 128  }
  0x56   : > { %574 = vsyncadd (%p860_p5), %s185_s5, 4294967168  ;;  %v223_v0 = vld [vmem:[%s179_s6] sm:$0xff]  ;;  %v224_v1 = vld [vmem:[%s188_s16] sm:$0xff]  ;;  %s372_s7 = sshll.u32 %s777_s15, 4  ;;  %s380_s19 = sshll.u32 %s593_s12, 8 }
  0x57   : > { %451 = vlog2.f32 %v223_v0  ;;  %v228_v2 = vsub.f32 1.0, %v224_v1  ;;  %s213_s30 = scalar_lea.vmem [#allocation7], %s372_s7  ;;  %s795_s28 = scalar_lea.hbm %s848_s2, %s380_s19 }
  0x58   : > { %s255_s20 = sshll.u32 %s213_s30, 4  ;;  %s242_s29 = scalar_lea.sflag [#allocation4], %s777_s15  ;;  %s797_s20 = int_to_ptr.vmem [resolvable:$true] %s255_s20 }
  0x59   : > { %453 = vlog2.f32 %v228_v2  ;;  %s515_s25 = scalar_lea.vmem %s797_s20, 256  ;;  %p861_p0 = scmp.ne.s32.totalorder %s853_s22, 0 }
  0x5a   : > { %p516_p8 = scmp.ne.s32.totalorder %s797_s20, %s515_s25  ;;  %s605_s12 = smov [#allocation7]  }
  0x5b   : > { %s519_s26 = sshll.u32 %s605_s12, 4  ;;  %s520_s26 = int_to_ptr.vmem [resolvable:$false] %s519_s26 }
  0x5c   : > { %p517_p7 = pnand %p516_p8, %p861_p0  ;;  %s521_s3 = scalar_lea.vmem %s520_s26, 512 }
  0x5d   : > { %p522_p10 = scmp.lt.s32.totalorder %s797_s20, %s520_s26  ;;  %p523_p12 = scmp.lt.s32.totalorder %s521_s3, %s515_s25 }
  0x5e   : > { %p518_p4 = pneg %p517_p7 }
  0x5f   : > { %p524_p1 = por %p523_p12, %p522_p10 }
  0x61   : > { %v452_v3 = vpop.eup %451  ;;  %p525_p2 = pnand %p524_p1, %p518_p4 }
  0x62   : > { %v226_v4 = vmul.f32 0.6931472, %v452_v3 }
  0x63   : > { %v454_v5 = vpop.eup %453 }
  0x64   : > { %v227_v6 = vmax.f32 %v226_v4, -100.0  ;;  %v230_v7 = vmul.f32 0.6931472, %v454_v5 }
  0x66   : > { %v231_v8 = vmax.f32 %v230_v7, -100.0  ;;  %235 = vst [vmem:[%s213_s30] sm:$0xff] %v227_v6 }
  0x68   : > { %374 = vst [vmem:[%s213_s30 + $0x8] sm:$0xff] %v231_v8 }
  0x69   : > { %528 = shalt.err (!%p525_p2)
}
  0x6a   : > { %s529_s8 = scalar_lea.hbm %s795_s28, 256  ;;  %s533_s6 = scalar_lea.hbm %s848_s2, 512 }
  0x6b   : > { %p530_p9 = scmp.ne.s32.totalorder %s795_s28, %s529_s8  ;;  %p534_p6 = scmp.lt.u32.totalorder %s795_s28, %s848_s2 }
  0x6c   : > { %p535_p13 = scmp.lt.u32.totalorder %s533_s6, %s529_s8  ;;  %p537_p8 = scmp.lt.u32.totalorder %s529_s8, %s795_s28 }
  0x6d   : > { %p531_p11 = pnand %p530_p9, %p861_p0 }
  0x6e   : > { %p536_p5 = por %p535_p13, %p534_p6 }
  0x6f   : > { %p532_p3 = pneg %p531_p11 }
  0x70   : > { %p538_p7 = por %p537_p8, %p536_p5 }
  0x72   : > { %p539_p4 = pnand %p538_p7, %p532_p3 }
  0x74   : > { %542 = shalt.err (!%p539_p4)
}
  0x75   : > { %s606_s7 = smov 128   ;;  %s607_s19 = smov 8  }
  0x76   : > { %385 = dma.vmem_to_hbm [thread:$0]  (%p861_p0), %s797_s20, 256, %s795_s28, %s242_s29, %s606_s7, %s606_s7, %s607_s19  }
  0x77 PF: > { %s270_s30 = sand.u32 1, %s581_s9   ;;  %p862_p10 = scmp.ne.s32.totalorder %s854_s24, 0 }
  0x78   : > { %p863_p12 = scmp.ge.s32.totalorder %s601_s14, 2  ;;  %s271_s21 = scalar_lea.sflag [#allocation4], %s270_s30 }
  0x7a   : > { %p395_p1 = pnand %p863_p12, %p862_p10 }
  0x7c   : > { %576 = dma.done.wait (!%p395_p1), %s271_s21, 256  }
  0x7d   : > { %578 = vsyncadd (!%p395_p1), %s271_s21, 4294967040  ;;  %s21_s14 = sadd.s32 1, %s601_s14   ;;  %s864_s9 = smov %s585_s10 }
  0x7e   : > { %p18_p2 = scmp.ge.s32.totalorder %s21_s14, 4   ;;  %s865_s10 = smov %s589_s11 }
  0x7f   : > { %s866_s11 = smov %s679_s23  ;;  %s867_s12 = smov %s597_s13 }
  0x80   : > { %s868_s13 = smov %s870_s17  ;;  %20 = sbr.rel (!%p18_p2) target bundleno = 8 (0x8), region = 91 }
  0x87   :  { %276 = vsyncpa [#allocation3], 1 }
  0x88   :  { %278 = vsyncpa [#allocation3 + $0x1], 1 }
  0x89   :  { %279 = vsyncpa [#allocation6], 1 }
  0x8a   :  { %281 = vsyncpa [#allocation6 + $0x1], 1 }
  0x8b   :  { %282 = vsyncpa [#allocation4], 1 }
  0x8c   :  { %284 = vsyncpa [#allocation4 + $0x1], 1 }

</bundles_post_ra>
